<compile_context>
chip_gen: v5e
topology: v5e:2x2
jax: 0.10.0
libtpu: 0.0.40
codegen_flags: <defaults>
</compile_context>

<pallas_src>
import math

import jax
import jax.numpy as jnp
from jax.experimental import pallas as pl
from jax.experimental.pallas import tpu as pltpu

NUM_HEADS = 4
INP_DIM = 32     # C
HID_DIM = 64     # H (hid_dim % num_heads == 0)


def make_mhca_call(B, N, Nk, C, H, Cp, nh, n_blocks):
    """Build the pallas_call for MHCA with `n_blocks` batch blocks."""
    assert B % n_blocks == 0
    B_blk = B // n_blocks
    dh = H // nh

    def kernel(q_ref, k_ref, v_ref, wq_ref, wk_ref, wv_ref, wfc_ref, bfc_ref,
               out_ref):
        # q_ref:(B_blk,N,C)   k_ref/v_ref:(B_blk,Nk,C)
        # wq/wk/wv:(C,H)  head-concatenated, 1/sqrt(dh) folded into Wq
        # wfc:(H,Cp)      zero-padded to a lane-dense 128-wide output
        # bfc:(1,Cp)
        cdt = wq_ref.dtype                         # MXU operand dtype (f32 or bf16)

        # Weight loads happen exactly once (no per-row loop anymore).
        wq = wq_ref[...]
        wk = wk_ref[...]
        wv = wv_ref[...]
        wfc = wfc_ref[...]
        bfc = bfc_ref[...]

        # ---- projections: one wide MXU matmul each ------------------------
        q2 = jnp.dot(q_ref[...].reshape(B_blk * N, C).astype(cdt), wq,
                     preferred_element_type=jnp.float32)        # (B_blk*N,  H)
        k2 = jnp.dot(k_ref[...].reshape(B_blk * Nk, C).astype(cdt), wk,
                     preferred_element_type=jnp.float32)        # (B_blk*Nk, H)
        v2 = jnp.dot(v_ref[...].reshape(B_blk * Nk, C).astype(cdt), wv,
                     preferred_element_type=jnp.float32)        # (B_blk*Nk, H)

        q3 = q2.reshape(B_blk, N, H)
        k3 = k2.reshape(B_blk, Nk, H)
        v3 = v2.reshape(B_blk, Nk, H)

        # ---- per-head attention: static lane slices, batched over B_blk ---
        heads = []
        for h in range(nh):                        # nh is a tiny static constant
            sl = slice(h * dh, (h + 1) * dh)
            qh = q3[:, :, sl]                      # (B_blk, N,  dh)
            kh = k3[:, :, sl]                      # (B_blk, Nk, dh)
            vh = v3[:, :, sl]                      # (B_blk, Nk, dh)
            s = jnp.einsum('bqd,bkd->bqk', qh, kh,
                           preferred_element_type=jnp.float32)  # (B_blk, N, Nk)
            s = s - jnp.max(s, axis=-1, keepdims=True)
            p = jnp.exp(s)
            p = p * pl.reciprocal(jnp.sum(p, axis=-1, keepdims=True), approx=True)
            heads.append(jnp.einsum('bqk,bkd->bqd',
                                    p.astype(cdt), vh.astype(cdt),
                                    preferred_element_type=jnp.float32))

        # ---- merge heads on lanes -> single output projection over H ------
        oc = jnp.concatenate(heads, axis=-1).reshape(B_blk * N, H)
        y = jnp.dot(oc.astype(cdt), wfc,
                    preferred_element_type=jnp.float32) + bfc   # (B_blk*N, Cp)
        out_ref[...] = y.reshape(B_blk, N, Cp)                  # one lane-dense store

    in_specs = [
        pl.BlockSpec((B_blk, N, C), lambda i: (i, 0, 0)),    # query block
        pl.BlockSpec((B_blk, Nk, C), lambda i: (i, 0, 0)),   # key block
        pl.BlockSpec((B_blk, Nk, C), lambda i: (i, 0, 0)),   # value block
        pl.BlockSpec((C, H), lambda i: (0, 0)),              # Wq (scaled, head-concat)
        pl.BlockSpec((C, H), lambda i: (0, 0)),              # Wk
        pl.BlockSpec((C, H), lambda i: (0, 0)),              # Wv
        pl.BlockSpec((H, Cp), lambda i: (0, 0)),             # Wfc (lane-padded)
        pl.BlockSpec((1, Cp), lambda i: (0, 0)),             # bfc (lane-padded)
    ]
    sem = ("parallel",) if n_blocks > 1 else ("arbitrary",)
    return pl.pallas_call(
        kernel,
        grid=(n_blocks,),
        in_specs=in_specs,
        out_specs=pl.BlockSpec((B_blk, N, Cp), lambda i: (i, 0, 0)),
        out_shape=jax.ShapeDtypeStruct((B, N, Cp), jnp.float32),
        compiler_params=pltpu.CompilerParams(dimension_semantics=sem),
    )


def _choose_n_blocks(B, N, Nk, C, H):
    """Split the batch across TensorCores (v7x) only when each block's MXU work
    clearly exceeds the fixed ~0.35us per-grid-step overhead.  On 1-TC v5e/v6e,
    and at small shapes on v7x, a single grid step is strictly better."""
    if B < 2 or B % 2 != 0:
        return 1
    flops_per_block = 2 * (B // 2) * ((N + 2 * Nk) * C * H     # projections
                                      + 2 * N * Nk * H         # scores + PV
                                      + N * H * C)             # output projection
    return 2 if flops_per_block > 2_000_000 else 1


def init_params(key, inp_dim=INP_DIM, hid_dim=HID_DIM):
    """Deterministic synthetic parameters in PyTorch layout (out_features, in_features)."""
    ks = jax.random.split(key, 5)

    def u(k, shape, fan_in):
        bound = 1.0 / math.sqrt(fan_in)
        return jax.random.uniform(k, shape, jnp.float32, -bound, bound)

    return dict(
        wq=u(ks[0], (hid_dim, inp_dim), inp_dim),    # nn.Linear(inp, hid, bias=False)
        wk=u(ks[1], (hid_dim, inp_dim), inp_dim),
        wv=u(ks[2], (hid_dim, inp_dim), inp_dim),
        wfc=u(ks[3], (inp_dim, hid_dim), hid_dim),   # nn.Linear(hid, inp)
        bfc=u(ks[4], (inp_dim,), hid_dim),
    )


def pack_params(params, num_heads, mxu_dtype=jnp.float32, lane_pad=128):
    """Repack PyTorch-layout weights in the wrapper:
       * Wq/Wk/Wv transposed to (C, H) so heads are concatenated on the lane
         (output) dim; the 1/sqrt(dh) attention scale is folded into Wq.
       * Wfc transposed to (H, C) and zero-padded (with the bias) to Cp=128
         lanes so the kernel's output store is lane-dense.
    """
    H, C = params['wq'].shape
    dh = H // num_heads
    inv_scale = 1.0 / math.sqrt(dh)

    wq = (params['wq'].T * inv_scale).astype(mxu_dtype)   # (C, H)
    wk = params['wk'].T.astype(mxu_dtype)
    wv = params['wv'].T.astype(mxu_dtype)

    C_out = params['wfc'].shape[0]
    Cp = ((C_out + lane_pad - 1) // lane_pad) * lane_pad
    wfc = jnp.zeros((H, Cp), mxu_dtype).at[:, :C_out].set(
        params['wfc'].T.astype(mxu_dtype))
    bfc = jnp.zeros((1, Cp), jnp.float32).at[:, :C_out].set(params['bfc'])
    return (wq, wk, wv, wfc, bfc), Cp


def mhca_forward(query, key, value, params, num_heads=NUM_HEADS,
                 mxu_dtype=jnp.float32):
    """MHCA forward.  Set mxu_dtype=jnp.bfloat16 on v6e/v7x at production sizes
    to halve MXU-operand / DMA bytes; softmax math stays f32 inside the kernel."""
    B, N, C = query.shape
    Nk = key.shape[1]
    H = params['wq'].shape[0]
    (wq, wk, wv, wfc, bfc), Cp = pack_params(params, num_heads, mxu_dtype)
    n_blocks = _choose_n_blocks(B, N, Nk, C, H)
    call = make_mhca_call(B, N, Nk, C, H, Cp, num_heads, n_blocks)
    out = call(query.astype(mxu_dtype), key.astype(mxu_dtype),
               value.astype(mxu_dtype), wq, wk, wv, wfc, bfc)
    return out[..., :C]          # drop the lane padding


# ---------------- pure-JAX reference (mirrors the PyTorch module) ----------------
def mhca_ref(query, key, value, params, num_heads=NUM_HEADS):
    B, N, C = query.shape
    H = params['wq'].shape[0]
    dh = H // num_heads
    Q = query @ params['wq'].T
    K = key @ params['wk'].T
    V = value @ params['wv'].T
    Q = Q.reshape(B, N, num_heads, dh).transpose(0, 2, 1, 3)
    K = K.reshape(B, -1, num_heads, dh).transpose(0, 2, 1, 3)
    V = V.reshape(B, -1, num_heads, dh).transpose(0, 2, 1, 3)
    energy = jnp.einsum('bhqd,bhkd->bhqk', Q, K) / math.sqrt(dh)
    attn = jax.nn.softmax(energy, axis=-1)
    x = jnp.einsum('bhqk,bhkd->bhqd', attn, V)
    x = x.transpose(0, 2, 1, 3).reshape(B, N, H)
    return x @ params['wfc'].T + params['bfc']


if __name__ == "__main__":
    B, N, Nk = 2, 8, 8
    root = jax.random.PRNGKey(0)
    kq, kk, kv, kp = jax.random.split(root, 4)
    query = jax.random.normal(kq, (B, N, INP_DIM), jnp.float32)
    key = jax.random.normal(kk, (B, Nk, INP_DIM), jnp.float32)
    value = jax.random.normal(kv, (B, Nk, INP_DIM), jnp.float32)
    params = init_params(kp)

    out = jax.block_until_ready(mhca_forward(query, key, value, params))
    ref = jax.block_until_ready(mhca_ref(query, key, value, params))

    assert out.shape == (B, N, INP_DIM)
    assert bool(jnp.allclose(out, ref, atol=1e-2, rtol=1e-2)), "mismatch vs reference"

    print("KERNEL_OK")
</pallas_src>

<mosaic_0001>
module attributes {stable_mosaic.version = 11 : i64} {
  func.func @kernel(%arg0: i32, %arg1: memref<2x8x32xf32, #tpu.memory_space<vmem>>, %arg2: memref<2x8x32xf32, #tpu.memory_space<vmem>>, %arg3: memref<2x8x32xf32, #tpu.memory_space<vmem>>, %arg4: memref<32x64xf32, #tpu.memory_space<vmem>>, %arg5: memref<32x64xf32, #tpu.memory_space<vmem>>, %arg6: memref<32x64xf32, #tpu.memory_space<vmem>>, %arg7: memref<64x128xf32, #tpu.memory_space<vmem>>, %arg8: memref<1x128xf32, #tpu.memory_space<vmem>>, %arg9: memref<2x8x128xf32, #tpu.memory_space<vmem>>) attributes {dimension_semantics = [#tpu.dimension_semantics<arbitrary>], iteration_bounds = array<i64: 1>, scalar_prefetch = 0 : i64, scratch_operands = 0 : i64, tpu.core_type = #tpu.core_type<tc>, window_params = [{transform_indices = @transform_0, window_bounds = array<i64: 2, 8, 32>}, {transform_indices = @transform_1, window_bounds = array<i64: 2, 8, 32>}, {transform_indices = @transform_2, window_bounds = array<i64: 2, 8, 32>}, {pipeline_mode = #tpu.pipeline_mode<synchronous>, transform_indices = @transform_3, window_bounds = array<i64: 32, 64>}, {pipeline_mode = #tpu.pipeline_mode<synchronous>, transform_indices = @transform_4, window_bounds = array<i64: 32, 64>}, {pipeline_mode = #tpu.pipeline_mode<synchronous>, transform_indices = @transform_5, window_bounds = array<i64: 32, 64>}, {pipeline_mode = #tpu.pipeline_mode<synchronous>, transform_indices = @transform_6, window_bounds = array<i64: 64, 128>}, {pipeline_mode = #tpu.pipeline_mode<synchronous>, transform_indices = @transform_7, window_bounds = array<i64: 1, 128>}, {transform_indices = @transform_8, window_bounds = array<i64: 2, 8, 128>}]} {
    %c0 = arith.constant 0 : index
    %c0_0 = arith.constant 0 : index
    %0 = vector.load %arg4[%c0, %c0_0] : memref<32x64xf32, #tpu.memory_space<vmem>>, vector<32x64xf32>
    %c0_1 = arith.constant 0 : index
    %c0_2 = arith.constant 0 : index
    %1 = vector.load %arg5[%c0_1, %c0_2] : memref<32x64xf32, #tpu.memory_space<vmem>>, vector<32x64xf32>
    %c0_3 = arith.constant 0 : index
    %c0_4 = arith.constant 0 : index
    %2 = vector.load %arg6[%c0_3, %c0_4] : memref<32x64xf32, #tpu.memory_space<vmem>>, vector<32x64xf32>
    %c0_5 = arith.constant 0 : index
    %c0_6 = arith.constant 0 : index
    %3 = vector.load %arg7[%c0_5, %c0_6] : memref<64x128xf32, #tpu.memory_space<vmem>>, vector<64x128xf32>
    %c0_7 = arith.constant 0 : index
    %c0_8 = arith.constant 0 : index
    %4 = vector.load %arg8[%c0_7, %c0_8] : memref<1x128xf32, #tpu.memory_space<vmem>>, vector<1x128xf32>
    %c0_9 = arith.constant 0 : index
    %c0_10 = arith.constant 0 : index
    %c0_11 = arith.constant 0 : index
    %5 = vector.load %arg1[%c0_9, %c0_10, %c0_11] : memref<2x8x32xf32, #tpu.memory_space<vmem>>, vector<2x8x32xf32>
    %6 = vector.shape_cast %5 : vector<2x8x32xf32> to vector<16x32xf32>
    %cst = arith.constant dense<0.000000e+00> : vector<16x64xf32>
    %7 = tpu.matmul %6, %0, %cst {dimension_numbers = #tpu.dot_dimension_numbers<[1], [0], [0], [1], [0, 0, 1, 1], [], []>} : vector<16x32xf32>, vector<32x64xf32>, vector<16x64xf32> -> vector<16x64xf32>
    %c0_12 = arith.constant 0 : index
    %c0_13 = arith.constant 0 : index
    %c0_14 = arith.constant 0 : index
    %8 = vector.load %arg2[%c0_12, %c0_13, %c0_14] : memref<2x8x32xf32, #tpu.memory_space<vmem>>, vector<2x8x32xf32>
    %9 = vector.shape_cast %8 : vector<2x8x32xf32> to vector<16x32xf32>
    %cst_15 = arith.constant dense<0.000000e+00> : vector<16x64xf32>
    %10 = tpu.matmul %9, %1, %cst_15 {dimension_numbers = #tpu.dot_dimension_numbers<[1], [0], [0], [1], [0, 0, 1, 1], [], []>} : vector<16x32xf32>, vector<32x64xf32>, vector<16x64xf32> -> vector<16x64xf32>
    %c0_16 = arith.constant 0 : index
    %c0_17 = arith.constant 0 : index
    %c0_18 = arith.constant 0 : index
    %11 = vector.load %arg3[%c0_16, %c0_17, %c0_18] : memref<2x8x32xf32, #tpu.memory_space<vmem>>, vector<2x8x32xf32>
    %12 = vector.shape_cast %11 : vector<2x8x32xf32> to vector<16x32xf32>
    %cst_19 = arith.constant dense<0.000000e+00> : vector<16x64xf32>
    %13 = tpu.matmul %12, %2, %cst_19 {dimension_numbers = #tpu.dot_dimension_numbers<[1], [0], [0], [1], [0, 0, 1, 1], [], []>} : vector<16x32xf32>, vector<32x64xf32>, vector<16x64xf32> -> vector<16x64xf32>
    %14 = vector.shape_cast %7 : vector<16x64xf32> to vector<2x8x64xf32>
    %15 = vector.shape_cast %10 : vector<16x64xf32> to vector<2x8x64xf32>
    %16 = vector.shape_cast %13 : vector<16x64xf32> to vector<2x8x64xf32>
    %17 = vector.extract_strided_slice %14 {offsets = [0, 0, 0], sizes = [2, 8, 16], strides = [1, 1, 1]} : vector<2x8x64xf32> to vector<2x8x16xf32>
    %18 = vector.extract_strided_slice %15 {offsets = [0, 0, 0], sizes = [2, 8, 16], strides = [1, 1, 1]} : vector<2x8x64xf32> to vector<2x8x16xf32>
    %19 = vector.extract_strided_slice %16 {offsets = [0, 0, 0], sizes = [2, 8, 16], strides = [1, 1, 1]} : vector<2x8x64xf32> to vector<2x8x16xf32>
    "tpu.trace_start"() <{level = 10 : i32, message = "bqd,bkd->bqk"}> : () -> ()
    %cst_20 = arith.constant dense<0.000000e+00> : vector<2x8x8xf32>
    %20 = tpu.matmul %17, %18, %cst_20 {dimension_numbers = #tpu.dot_dimension_numbers<[2], [2], [1], [1], [0, 0, 0, 1, 1, 1], [0], [0]>} : vector<2x8x16xf32>, vector<2x8x16xf32>, vector<2x8x8xf32> -> vector<2x8x8xf32>
    "tpu.trace_stop"() : () -> ()
    %cst_21 = arith.constant dense<0xFF800000> : vector<2x8xf32>
    %21 = vector.multi_reduction <maximumf>, %20, %cst_21 [2] : vector<2x8x8xf32> to vector<2x8xf32>
    %22 = vector.shape_cast %21 : vector<2x8xf32> to vector<2x8x1xf32>
    %23 = vector.broadcast %22 : vector<2x8x1xf32> to vector<2x8x8xf32>
    %24 = arith.subf %20, %23 : vector<2x8x8xf32>
    %25 = math.exp %24 : vector<2x8x8xf32>
    %cst_22 = arith.constant dense<0.000000e+00> : vector<2x8xf32>
    %26 = vector.multi_reduction <add>, %25, %cst_22 [2] : vector<2x8x8xf32> to vector<2x8xf32>
    %27 = vector.shape_cast %26 : vector<2x8xf32> to vector<2x8x1xf32>
    %28 = tpu.reciprocal %27 {approx = true} : vector<2x8x1xf32> -> vector<2x8x1xf32>
    %29 = vector.broadcast %28 : vector<2x8x1xf32> to vector<2x8x8xf32>
    %30 = arith.mulf %25, %29 : vector<2x8x8xf32>
    "tpu.trace_start"() <{level = 10 : i32, message = "bqk,bkd->bqd"}> : () -> ()
    %cst_23 = arith.constant dense<0.000000e+00> : vector<2x8x16xf32>
    %31 = tpu.matmul %30, %19, %cst_23 {dimension_numbers = #tpu.dot_dimension_numbers<[2], [1], [1], [2], [0, 0, 0, 1, 1, 2], [0], [0]>} : vector<2x8x8xf32>, vector<2x8x16xf32>, vector<2x8x16xf32> -> vector<2x8x16xf32>
    "tpu.trace_stop"() : () -> ()
    %32 = vector.extract_strided_slice %14 {offsets = [0, 0, 16], sizes = [2, 8, 16], strides = [1, 1, 1]} : vector<2x8x64xf32> to vector<2x8x16xf32>
    %33 = vector.extract_strided_slice %15 {offsets = [0, 0, 16], sizes = [2, 8, 16], strides = [1, 1, 1]} : vector<2x8x64xf32> to vector<2x8x16xf32>
    %34 = vector.extract_strided_slice %16 {offsets = [0, 0, 16], sizes = [2, 8, 16], strides = [1, 1, 1]} : vector<2x8x64xf32> to vector<2x8x16xf32>
    "tpu.trace_start"() <{level = 10 : i32, message = "bqd,bkd->bqk"}> : () -> ()
    %cst_24 = arith.constant dense<0.000000e+00> : vector<2x8x8xf32>
    %35 = tpu.matmul %32, %33, %cst_24 {dimension_numbers = #tpu.dot_dimension_numbers<[2], [2], [1], [1], [0, 0, 0, 1, 1, 1], [0], [0]>} : vector<2x8x16xf32>, vector<2x8x16xf32>, vector<2x8x8xf32> -> vector<2x8x8xf32>
    "tpu.trace_stop"() : () -> ()
    %cst_25 = arith.constant dense<0xFF800000> : vector<2x8xf32>
    %36 = vector.multi_reduction <maximumf>, %35, %cst_25 [2] : vector<2x8x8xf32> to vector<2x8xf32>
    %37 = vector.shape_cast %36 : vector<2x8xf32> to vector<2x8x1xf32>
    %38 = vector.broadcast %37 : vector<2x8x1xf32> to vector<2x8x8xf32>
    %39 = arith.subf %35, %38 : vector<2x8x8xf32>
    %40 = math.exp %39 : vector<2x8x8xf32>
    %cst_26 = arith.constant dense<0.000000e+00> : vector<2x8xf32>
    %41 = vector.multi_reduction <add>, %40, %cst_26 [2] : vector<2x8x8xf32> to vector<2x8xf32>
    %42 = vector.shape_cast %41 : vector<2x8xf32> to vector<2x8x1xf32>
    %43 = tpu.reciprocal %42 {approx = true} : vector<2x8x1xf32> -> vector<2x8x1xf32>
    %44 = vector.broadcast %43 : vector<2x8x1xf32> to vector<2x8x8xf32>
    %45 = arith.mulf %40, %44 : vector<2x8x8xf32>
    "tpu.trace_start"() <{level = 10 : i32, message = "bqk,bkd->bqd"}> : () -> ()
    %cst_27 = arith.constant dense<0.000000e+00> : vector<2x8x16xf32>
    %46 = tpu.matmul %45, %34, %cst_27 {dimension_numbers = #tpu.dot_dimension_numbers<[2], [1], [1], [2], [0, 0, 0, 1, 1, 2], [0], [0]>} : vector<2x8x8xf32>, vector<2x8x16xf32>, vector<2x8x16xf32> -> vector<2x8x16xf32>
    "tpu.trace_stop"() : () -> ()
    %47 = vector.extract_strided_slice %14 {offsets = [0, 0, 32], sizes = [2, 8, 16], strides = [1, 1, 1]} : vector<2x8x64xf32> to vector<2x8x16xf32>
    %48 = vector.extract_strided_slice %15 {offsets = [0, 0, 32], sizes = [2, 8, 16], strides = [1, 1, 1]} : vector<2x8x64xf32> to vector<2x8x16xf32>
    %49 = vector.extract_strided_slice %16 {offsets = [0, 0, 32], sizes = [2, 8, 16], strides = [1, 1, 1]} : vector<2x8x64xf32> to vector<2x8x16xf32>
    "tpu.trace_start"() <{level = 10 : i32, message = "bqd,bkd->bqk"}> : () -> ()
    %cst_28 = arith.constant dense<0.000000e+00> : vector<2x8x8xf32>
    %50 = tpu.matmul %47, %48, %cst_28 {dimension_numbers = #tpu.dot_dimension_numbers<[2], [2], [1], [1], [0, 0, 0, 1, 1, 1], [0], [0]>} : vector<2x8x16xf32>, vector<2x8x16xf32>, vector<2x8x8xf32> -> vector<2x8x8xf32>
    "tpu.trace_stop"() : () -> ()
    %cst_29 = arith.constant dense<0xFF800000> : vector<2x8xf32>
    %51 = vector.multi_reduction <maximumf>, %50, %cst_29 [2] : vector<2x8x8xf32> to vector<2x8xf32>
    %52 = vector.shape_cast %51 : vector<2x8xf32> to vector<2x8x1xf32>
    %53 = vector.broadcast %52 : vector<2x8x1xf32> to vector<2x8x8xf32>
    %54 = arith.subf %50, %53 : vector<2x8x8xf32>
    %55 = math.exp %54 : vector<2x8x8xf32>
    %cst_30 = arith.constant dense<0.000000e+00> : vector<2x8xf32>
    %56 = vector.multi_reduction <add>, %55, %cst_30 [2] : vector<2x8x8xf32> to vector<2x8xf32>
    %57 = vector.shape_cast %56 : vector<2x8xf32> to vector<2x8x1xf32>
    %58 = tpu.reciprocal %57 {approx = true} : vector<2x8x1xf32> -> vector<2x8x1xf32>
    %59 = vector.broadcast %58 : vector<2x8x1xf32> to vector<2x8x8xf32>
    %60 = arith.mulf %55, %59 : vector<2x8x8xf32>
    "tpu.trace_start"() <{level = 10 : i32, message = "bqk,bkd->bqd"}> : () -> ()
    %cst_31 = arith.constant dense<0.000000e+00> : vector<2x8x16xf32>
    %61 = tpu.matmul %60, %49, %cst_31 {dimension_numbers = #tpu.dot_dimension_numbers<[2], [1], [1], [2], [0, 0, 0, 1, 1, 2], [0], [0]>} : vector<2x8x8xf32>, vector<2x8x16xf32>, vector<2x8x16xf32> -> vector<2x8x16xf32>
    "tpu.trace_stop"() : () -> ()
    %62 = vector.extract_strided_slice %14 {offsets = [0, 0, 48], sizes = [2, 8, 16], strides = [1, 1, 1]} : vector<2x8x64xf32> to vector<2x8x16xf32>
    %63 = vector.extract_strided_slice %15 {offsets = [0, 0, 48], sizes = [2, 8, 16], strides = [1, 1, 1]} : vector<2x8x64xf32> to vector<2x8x16xf32>
    %64 = vector.extract_strided_slice %16 {offsets = [0, 0, 48], sizes = [2, 8, 16], strides = [1, 1, 1]} : vector<2x8x64xf32> to vector<2x8x16xf32>
    "tpu.trace_start"() <{level = 10 : i32, message = "bqd,bkd->bqk"}> : () -> ()
    %cst_32 = arith.constant dense<0.000000e+00> : vector<2x8x8xf32>
    %65 = tpu.matmul %62, %63, %cst_32 {dimension_numbers = #tpu.dot_dimension_numbers<[2], [2], [1], [1], [0, 0, 0, 1, 1, 1], [0], [0]>} : vector<2x8x16xf32>, vector<2x8x16xf32>, vector<2x8x8xf32> -> vector<2x8x8xf32>
    "tpu.trace_stop"() : () -> ()
    %cst_33 = arith.constant dense<0xFF800000> : vector<2x8xf32>
    %66 = vector.multi_reduction <maximumf>, %65, %cst_33 [2] : vector<2x8x8xf32> to vector<2x8xf32>
    %67 = vector.shape_cast %66 : vector<2x8xf32> to vector<2x8x1xf32>
    %68 = vector.broadcast %67 : vector<2x8x1xf32> to vector<2x8x8xf32>
    %69 = arith.subf %65, %68 : vector<2x8x8xf32>
    %70 = math.exp %69 : vector<2x8x8xf32>
    %cst_34 = arith.constant dense<0.000000e+00> : vector<2x8xf32>
    %71 = vector.multi_reduction <add>, %70, %cst_34 [2] : vector<2x8x8xf32> to vector<2x8xf32>
    %72 = vector.shape_cast %71 : vector<2x8xf32> to vector<2x8x1xf32>
    %73 = tpu.reciprocal %72 {approx = true} : vector<2x8x1xf32> -> vector<2x8x1xf32>
    %74 = vector.broadcast %73 : vector<2x8x1xf32> to vector<2x8x8xf32>
    %75 = arith.mulf %70, %74 : vector<2x8x8xf32>
    "tpu.trace_start"() <{level = 10 : i32, message = "bqk,bkd->bqd"}> : () -> ()
    %cst_35 = arith.constant dense<0.000000e+00> : vector<2x8x16xf32>
    %76 = tpu.matmul %75, %64, %cst_35 {dimension_numbers = #tpu.dot_dimension_numbers<[2], [1], [1], [2], [0, 0, 0, 1, 1, 2], [0], [0]>} : vector<2x8x8xf32>, vector<2x8x16xf32>, vector<2x8x16xf32> -> vector<2x8x16xf32>
    "tpu.trace_stop"() : () -> ()
    %77 = tpu.concatenate %31, %46, %61, %76 in 2 : vector<2x8x16xf32>, vector<2x8x16xf32>, vector<2x8x16xf32>, vector<2x8x16xf32> -> vector<2x8x64xf32>
    %78 = vector.shape_cast %77 : vector<2x8x64xf32> to vector<16x64xf32>
    %cst_36 = arith.constant dense<0.000000e+00> : vector<16x128xf32>
    %79 = tpu.matmul %78, %3, %cst_36 {dimension_numbers = #tpu.dot_dimension_numbers<[1], [0], [0], [1], [0, 0, 1, 1], [], []>} : vector<16x64xf32>, vector<64x128xf32>, vector<16x128xf32> -> vector<16x128xf32>
    %80 = vector.broadcast %4 : vector<1x128xf32> to vector<16x128xf32>
    %81 = arith.addf %79, %80 : vector<16x128xf32>
    %82 = vector.shape_cast %81 : vector<16x128xf32> to vector<2x8x128xf32>
    %c0_37 = arith.constant 0 : index
    %c0_38 = arith.constant 0 : index
    %c0_39 = arith.constant 0 : index
    %83 = vector.load %arg9[%c0_37, %c0_38, %c0_39] : memref<2x8x128xf32, #tpu.memory_space<vmem>>, vector<2x8x128xf32>
    tpu.vector_store %arg9[%c0_37, %c0_38, %c0_39], %82 {strides = array<i32>} : memref<2x8x128xf32, #tpu.memory_space<vmem>>, vector<2x8x128xf32>,
    return
  }
  func.func @transform_0(%arg0: i32) -> (i32, i32, i32) {
    %c0_i32 = arith.constant 0 : i32
    %c0_i32_0 = arith.constant 0 : i32
    %c0_i32_1 = arith.constant 0 : i32
    return %arg0, %c0_i32, %c0_i32_0 : i32, i32, i32
  }
  func.func @transform_1(%arg0: i32) -> (i32, i32, i32) {
    %c0_i32 = arith.constant 0 : i32
    %c0_i32_0 = arith.constant 0 : i32
    %c0_i32_1 = arith.constant 0 : i32
    return %arg0, %c0_i32, %c0_i32_0 : i32, i32, i32
  }
  func.func @transform_2(%arg0: i32) -> (i32, i32, i32) {
    %c0_i32 = arith.constant 0 : i32
    %c0_i32_0 = arith.constant 0 : i32
    %c0_i32_1 = arith.constant 0 : i32
    return %arg0, %c0_i32, %c0_i32_0 : i32, i32, i32
  }
  func.func @transform_3(%arg0: i32) -> (i32, i32) {
    %c0_i32 = arith.constant 0 : i32
    %c0_i32_0 = arith.constant 0 : i32
    %c0_i32_1 = arith.constant 0 : i32
    return %c0_i32, %c0_i32_0 : i32, i32
  }
  func.func @transform_4(%arg0: i32) -> (i32, i32) {
    %c0_i32 = arith.constant 0 : i32
    %c0_i32_0 = arith.constant 0 : i32
    %c0_i32_1 = arith.constant 0 : i32
    return %c0_i32, %c0_i32_0 : i32, i32
  }
  func.func @transform_5(%arg0: i32) -> (i32, i32) {
    %c0_i32 = arith.constant 0 : i32
    %c0_i32_0 = arith.constant 0 : i32
    %c0_i32_1 = arith.constant 0 : i32
    return %c0_i32, %c0_i32_0 : i32, i32
  }
  func.func @transform_6(%arg0: i32) -> (i32, i32) {
    %c0_i32 = arith.constant 0 : i32
    %c0_i32_0 = arith.constant 0 : i32
    %c0_i32_1 = arith.constant 0 : i32
    return %c0_i32, %c0_i32_0 : i32, i32
  }
  func.func @transform_7(%arg0: i32) -> (i32, i32) {
    %c0_i32 = arith.constant 0 : i32
    %c0_i32_0 = arith.constant 0 : i32
    %c0_i32_1 = arith.constant 0 : i32
    return %c0_i32, %c0_i32_0 : i32, i32
  }
  func.func @transform_8(%arg0: i32) -> (i32, i32, i32) {
    %c0_i32 = arith.constant 0 : i32
    %c0_i32_0 = arith.constant 0 : i32
    %c0_i32_1 = arith.constant 0 : i32
    return %arg0, %c0_i32, %c0_i32_0 : i32, i32, i32
  }
}

</mosaic_0001>

<bundles_post_ra>
// kernel: tpu_custom_call.1
= control target key start
LH: loop header
LB: loop body
LE: loop exit
PB: predicated region body
PF: predicated region fallthrough
CT: control target
= control target key end

     0   :  { %13 = vsyncpa [#allocation3], 0  ;;  %s1335_s0 = inlined_call_operand.hbm [shape: f32[2,8,32], index: 0, kind: input, shape index: {}]   ;;  %s1336_s1 = inlined_call_operand.hbm [shape: f32[2,8,32], index: 1, kind: input, shape index: {}]   ;;  %s1337_s2 = inlined_call_operand.hbm [shape: f32[2,8,32], index: 2, kind: input, shape index: {}]   ;;  %s1338_s3 = inlined_call_operand.hbm [shape: f32[32,64], index: 3, kind: input, shape index: {}]   ;;  %s1339_s4 = inlined_call_operand.hbm [shape: f32[32,64], index: 4, kind: input, shape index: {}]   ;;  %s1340_s5 = inlined_call_operand.hbm [shape: f32[32,64], index: 5, kind: input, shape index: {}]   ;;  %s1341_s6 = inlined_call_operand.hbm [shape: f32[64,128], index: 6, kind: input, shape index: {}]   ;;  %s1342_s7 = inlined_call_operand.vmem [shape: f32[1,128], index: 7, kind: input, shape index: {}]   ;;  %s1343_s8 = inlined_call_operand.hbm [shape: f32[2,8,128], index: 8, kind: output, shape index: {}]  }
   0x1   :  { %14 = vsyncpa [#allocation6], 0 }
   0x2   :  { %15 = vsyncpa [#allocation9], 0 }
   0x3   :  { %16 = vsyncpa [#allocation12], 0 }
   0x4   :  { %17 = vsyncpa [#allocation4], 0  ;;  %s35_s29 = sshll.u32 %s1336_s1, 4  ;;  %s1144_s30 = smov [#allocation5]   ;;  %s36_s29 = int_to_ptr.hbm [resolvable:$true] %s35_s29 }
   0x5   :  { %s37_s9 = sshll.u32 %s1144_s30, 4  ;;  %s61_s12 = sshll.u32 %s1338_s3, 4  ;;  %s38_s9 = int_to_ptr.vmem [resolvable:$true] %s37_s9  ;;  %s62_s12 = int_to_ptr.hbm [resolvable:$true] %s61_s12 }
   0x6   :  { %s1145_s13 = smov 128   ;;  %s1146_s14 = smov 8  }
   0x7   :  { %43 = dma.hbm_to_vmem [thread:$0]  %s36_s29, 256, %s38_s9, [#allocation6], %s1145_s13, %s1145_s13, %s1146_s14  }
   0x8   :  { %s1147_s15 = smov [#allocation8]   ;;  %s87_s1 = sshll.u32 %s1340_s5, 4  ;;  %s88_s1 = int_to_ptr.hbm [resolvable:$true] %s87_s1 }
   0x9   :  { %s63_s16 = sshll.u32 %s1147_s15, 4  ;;  %s22_s20 = sshll.u32 %s1335_s0, 4  ;;  %s64_s16 = int_to_ptr.vmem [resolvable:$true] %s63_s16  ;;  %s23_s20 = int_to_ptr.hbm [resolvable:$true] %s22_s20 }
   0xa   :  { %69 = dma.hbm_to_vmem [thread:$0]  %s62_s12, 512, %s64_s16, [#allocation9], %s1145_s13, %s1145_s13, %s1146_s14  }
   0xb   :  { %s1148_s21 = smov [#allocation11]   ;;  %s1149_s23 = smov [#allocation2]  }
   0xc   :  { %s89_s22 = sshll.u32 %s1148_s21, 4  ;;  %s24_s5 = sshll.u32 %s1149_s23, 4  ;;  %s90_s22 = int_to_ptr.vmem [resolvable:$true] %s89_s22  ;;  %s25_s5 = int_to_ptr.vmem [resolvable:$true] %s24_s5 }
   0xd   :  { %95 = dma.hbm_to_vmem [thread:$0]  %s88_s1, 512, %s90_s22, [#allocation12], %s1145_s13, %s1145_s13, %s1146_s14  }
   0xe   :  { %s48_s26 = sshll.u32 %s1337_s2, 4  ;;  %s74_s28 = sshll.u32 %s1339_s4, 4  ;;  %s49_s26 = int_to_ptr.hbm [resolvable:$true] %s48_s26  ;;  %s75_s28 = int_to_ptr.hbm [resolvable:$true] %s74_s28 }
   0xf   :  { %30 = dma.hbm_to_vmem [thread:$0]  %s23_s20, 256, %s25_s5, [#allocation3], %s1145_s13, %s1145_s13, %s1146_s14  }
  0x10   :  { %s1150_s29 = smov [#allocation7]   ;;  %s1151_s9 = smov [#allocation10]  }
  0x11   :  { %s50_s30 = sshll.u32 %s1150_s29, 4  ;;  %s76_s2 = sshll.u32 %s1151_s9, 4  ;;  %s51_s30 = int_to_ptr.vmem [resolvable:$true] %s50_s30  ;;  %s77_s2 = int_to_ptr.vmem [resolvable:$true] %s76_s2 }
  0x12   :  { %56 = dma.hbm_to_vmem [thread:$0]  %s49_s26, 256, %s51_s30, [#allocation6], %s1145_s13, %s1145_s13, %s1146_s14  }
  0x13   :  { %s100_s12 = sshll.u32 %s1341_s6, 4  ;;  %s1152_s4 = smov [#allocation13]   ;;  %s101_s12 = int_to_ptr.hbm [resolvable:$true] %s100_s12 }
  0x14   :  { %82 = dma.hbm_to_vmem [thread:$0]  %s75_s28, 512, %s77_s2, [#allocation9], %s1145_s13, %s1145_s13, %s1146_s14  }
  0x15   :  { %s102_s15 = sshll.u32 %s1152_s4, 4  ;;  %s103_s15 = int_to_ptr.vmem [resolvable:$true] %s102_s15 }
  0x16   :  { %108 = dma.hbm_to_vmem [thread:$0]  %s101_s12, 1024, %s103_s15, [#allocation12], %s1145_s13, %s1145_s13, %s1146_s14  }
  0x17   :  { %1134 = dma.done.wait [#allocation3], 256  }
  0x18   :  { %1135 = vsyncadd [#allocation3], 4294967040 }
  0x19   :  { %1136 = dma.done.wait [#allocation6], 512  }
  0x1a   :  { %1137 = vsyncadd [#allocation6], 4294966784 }
  0x1b   :  { %1138 = dma.done.wait [#allocation9], 1024  }
  0x1c   :  { %1139 = vsyncadd [#allocation9], 4294966272 }
  0x1d   :  { %1140 = dma.done.wait [#allocation12], 1536  }
  0x1e   :  { %1141 = vsyncadd [#allocation12], 4294965760  ;;  %v146_v0 = vld [vmem:[#allocation10 + $0x18] sm:$0xff]  ;;  %v145_v1 = vld [vmem:[#allocation10 + $0x10] sm:$0xff]  ;;  %vm162_vm0 = vcmask 261120   ;;  %vm254_vm1 = vcmask 130048  }
  0x1f   :  { %212 = vmatpush.msra.mxu2 %v146_v0  ;;  %v142_v2 = vld [vmem:[#allocation8 + $0x18] sm:$0xff]  ;;  %v144_v3 = vld [vmem:[#allocation10 + $0x8] sm:$0xff]  ;;  %v141_v4 = vld [vmem:[#allocation8 + $0x10] sm:$0xff]  ;;  %s1153_s6 = smov 96   ;;  %s1154_s16 = smov 112   ;;  %vm307_vm2 = vcmask 64512  }
  0x20   :  { %181 = vmatpush.msra.mxu0 %v142_v2  ;;  %v140_v5 = vld [vmem:[#allocation8 + $0x8] sm:$0xff]  ;;  %v143_v6 = vld [vmem:[#allocation10] sm:$0xff]  ;;  %v160_v9 = vld [vmem:[#allocation2] sm:$0xff]  ;;  %s1155_s17 = smov 80   ;;  %s1156_s18 = smov 16   ;;  %vm796_vm3 = vcmask 392192  }
  0x21   :  { %213 = vmatpush.msra.mxu2 %v145_v1  ;;  %v192_v7 = vld [vmem:[#allocation5] sm:$0xff]  ;;  %v193_v10 = vld [vmem:[#allocation5 + $0x8] sm:$0xff]  ;;  %v161_v11 = vld [vmem:[#allocation2 + $0x8] sm:$0xff]  ;;  %s1157_s1 = smov 32   ;;  %s1158_s3 = smov 48   ;;  %vm802_vm4 = vcmask 523264  }
  0x22   :  { %182 = vmatpush.msra.mxu0 %v141_v4  ;;  %v139_v8 = vld [vmem:[#allocation8] sm:$0xff]  ;;  %v150_v16 = vld [vmem:[#allocation11 + $0x18] sm:$0xff]  ;;  %v149_v17 = vld [vmem:[#allocation11 + $0x10] sm:$0xff]  ;;  %s1159_s21 = smov [#allocation14]   ;;  %s840_s24 = sshll.u32 %s1343_s8, 4  ;;  %s841_s24 = int_to_ptr.hbm [resolvable:$true] %s840_s24 }
  0x23   :  { %214 = vmatpush.msra.mxu2 %v144_v3  ;;  %v148_v18 = vld [vmem:[#allocation11 + $0x8] sm:$0xff]  ;;  %v147_v19 = vld [vmem:[#allocation11] sm:$0xff]  ;;  %v223_v20 = vld [vmem:[#allocation7] sm:$0xff]  ;;  %s838_s22 = sshll.u32 %s1159_s21, 4  ;;  %s839_s22 = int_to_ptr.vmem [resolvable:$true] %s838_s22 }
  0x24   :  { %183 = vmatpush.msra.mxu0 %v140_v5  ;;  %v224_v21 = vld [vmem:[#allocation7 + $0x8] sm:$0xff] }
  0x25   :  { %215 = vmatpush.msra.mxu2 %v143_v6 }
  0x26   :  { %858 = vmatmul.msk.f32.vlgmr.msra.gmra.mxu2 %vm162_vm0, %v192_v7  ;;  %184 = vmatpush.msra.mxu0 %v139_v8 }
  0x27   :  { %856 = vmatmul.msk.f32.vlgmr.msra.gmra.mxu0 %vm162_vm0, %v160_v9  ;;  %243 = vmatpush.msrb.mxu2 %v150_v16 }
  0x29   :  { %244 = vmatpush.msrb.mxu2 %v149_v17 }
  0x2b   :  { %245 = vmatpush.msrb.mxu2 %v148_v18 }
  0x2d   :  { %246 = vmatpush.msrb.mxu2 %v147_v19 }
  0x2e   :  { %859 = vmatmul.msk.f32.gmra.mxu2 %vm162_vm0, %v193_v10 }
  0x2f   :  { %857 = vmatmul.msk.f32.gmra.mxu0 %vm162_vm0, %v161_v11 }
  0x36   :  { %860 = vmatmul.msk.f32.vlgmr.msrb.gmra.mxu2 %vm162_vm0, %v223_v20 }
  0x3e   :  { %861 = vmatmul.msk.f32.gmra.mxu2 %vm162_vm0, %v224_v21 }
  0xa4   :  { %v186_v13 = vpop.f32.mrf.mxu0 }
  0xa9   :  { %v217_v12 = vpop.f32.mrf.mxu2 }
  0xaa   :  { %510 = vrot.lane.b32.xlu2 %v217_v12, %s1153_s6  ;;  %378 = vrot.lane.b32.xlu0 %v217_v12, %s1154_s16 }
  0xab   :  { %862 = vmatpush.xpose.msk.msra.mxu3 %vm254_vm1, %v217_v12 }
  0xac   :  { %v189_v15 = vpop.f32.mrf.mxu0 }
  0xae   :  { %863 = vmatmul.msk.f32.vlgmr.msra.gmra.mxu3 %vm254_vm1, %v186_v13 }
  0xb1   :  { %v220_v14 = vpop.f32.mrf.mxu2 }
  0xb2   :  { %406 = vrot.lane.b32.xlu1 %v220_v14, %s1154_s16  ;;  %864 = vmatpush.xpose.msk.msrb.mxu3 %vm254_vm1, %v220_v14 }
  0xb3   :  { %508 = vrot.lane.b32.xlu2 %v186_v13, %s1153_s6  ;;  %376 = vrot.lane.b32.xlu0 %v186_v13, %s1154_s16 }
  0xb6   :  { %865 = vmatmul.msk.f32.vlgmr.msrb.gmra.mxu3 %vm254_vm1, %v189_v15 }
  0xb9   :  { %v1283_v38 = vpop.f32.mrf.mxu2 }
  0xba   :  { %404 = vrot.lane.b32.xlu1 %v189_v15, %s1154_s16  ;;  %348 = vmatpush.msra.mxu3 %v1283_v38 }
  0xbb   :  { %538 = vrot.lane.b32.xlu0 %v220_v14, %s1153_s6  ;;  %536 = vrot.lane.b32.xlu2 %v189_v15, %s1153_s6 }
  0xc1   :  { %v1286_v39 = vpop.f32.mrf.mxu2 }
  0xc2   :  { %640 = vrot.lane.b32.xlu1 %v217_v12, %s1155_s17  ;;  %371 = vmatpush.msrb.mxu0 %v1286_v39  ;;  %v904_v19 = vpack.i.bf16 %v1286_v39, %v1283_v38 }
  0xc3   :  { %638 = vrot.lane.b32.xlu0 %v186_v13, %s1155_s17  ;;  %666 = vrot.lane.b32.xlu2 %v189_v15, %s1155_s17 }
  0xca   :  { %668 = vrot.lane.b32.xlu1 %v220_v14, %s1155_s17 }
 0x104   :  { %v511_v22 = vpop.permute.xlu2 %510 }
 0x10d   :  { %v509_v26 = vpop.permute.xlu2 %508 }
 0x115   :  { %v537_v29 = vpop.permute.xlu2 %536 }
 0x11c   :  { %v379_v23 = vpop.permute.xlu0 %378 }
 0x11d   :  { %868 = vmatpush.xpose.msk.msra.mxu1 %vm254_vm1, %v379_v23  ;;  %v667_v37 = vpop.permute.xlu2 %666 }
 0x124   :  { %v407_v24 = vpop.permute.xlu1 %406 }
 0x125   :  { %v377_v25 = vpop.permute.xlu0 %376  ;;  %870 = vmatpush.xpose.msk.msrb.mxu1 %vm254_vm1, %v407_v24 }
 0x126   :  { %869 = vmatmul.msk.f32.vlgmr.msra.gmra.mxu1 %vm254_vm1, %v377_v25 }
 0x129   :  { %874 = vmatpush.xpose.msk.msra.mxu1 %vm254_vm1, %v511_v22 }
 0x12c   :  { %v405_v27 = vpop.permute.xlu1 %404 }
 0x12d   :  { %v539_v28 = vpop.permute.xlu0 %538 }
 0x12e   :  { %871 = vmatmul.msk.f32.vlgmr.msrb.gmra.mxu1 %vm254_vm1, %v405_v27  ;;  %876 = vmatpush.xpose.msk.msra.mxu2 %vm254_vm1, %v539_v28 }
 0x131   :  { %v278_v30 = vpop.f32.mrf.mxu3  ;;  %877 = vmatmul.msk.f32.vlgmr.msra.gmra.mxu2 %vm254_vm1, %v537_v29 }
 0x132   :  { %v308_v31 = vsel %vm307_vm2, %v278_v30, -inf }
 0x133   :  { %309 = vmax.xlane.f32.xlu0 %v308_v31 }
 0x134   :  { %v641_v32 = vpop.permute.xlu1 %640 }
 0x135   :  { %880 = vmatpush.xpose.msk.msrb.mxu1 %vm254_vm1, %v641_v32  ;;  %v639_v36 = vpop.permute.xlu0 %638 }
 0x136   :  { %875 = vmatmul.msk.f32.vlgmr.msra.gmra.mxu1 %vm254_vm1, %v509_v26 }
 0x139   :  { %v304_v33 = vpop.f32.mrf.mxu3 }
 0x13a   :  { %v311_v34 = vsel %vm307_vm2, %v304_v33, -inf }
 0x13b   :  { %312 = vmax.xlane.f32.xlu2 %v311_v34 }
 0x13c   :  { %v669_v35 = vpop.permute.xlu1 %668 }
 0x13d   :  { %882 = vmatpush.xpose.msk.msrb.mxu2 %vm254_vm1, %v669_v35 }
 0x13e   :  { %881 = vmatmul.msk.f32.vlgmr.msrb.gmra.mxu1 %vm254_vm1, %v639_v36 }
 0x140   :  { %883 = vmatmul.msk.f32.vlgmr.msrb.gmra.mxu2 %vm254_vm1, %v667_v37 }
 0x1a3   :  { %v401_v40 = vpop.f32.mrf.mxu1 }
 0x1a4   :  { %v432_v41 = vsel %vm307_vm2, %v401_v40, -inf }
 0x1a5   :  { %433 = vmax.xlane.f32.xlu1 %v432_v41 }
 0x1a6   :  { %v310_v42 = vpop.xlane.xlu0 %309 }
 0x1a7   :  { %v314_v43 = vsub.f32 %v278_v30, %v310_v42 }
 0x1a9   :  { %v316_v44 = vmul.f32 1.442695, %v314_v43 }
 0x1ab   :  { %910 = vpow2.f32 %v316_v44  ;;  %v429_v45 = vpop.f32.mrf.mxu1 }
 0x1ac   :  { %v435_v46 = vsel %vm307_vm2, %v429_v45, -inf }
 0x1ad   :  { %436 = vmax.xlane.f32.xlu0 %v435_v46 }
 0x1ae   :  { %v313_v51 = vpop.xlane.xlu2 %312 }
 0x1af   :  { %v315_v53 = vsub.f32 %v304_v33, %v313_v51 }
 0x1b1   :  { %v911_v47 = vpop.eup %910  ;;  %v318_v57 = vmul.f32 1.442695, %v315_v53 }
 0x1b2   :  { %v320_v48 = vsel %vm307_vm2, %v911_v47, 0.0 }
 0x1b3   :  { %321 = vadd.xlane.f32.xlu1 %v320_v48  ;;  %v533_v49 = vpop.f32.mrf.mxu1  ;;  %912 = vpow2.f32 %v318_v57 }
 0x1b4   :  { %v564_v50 = vsel %vm307_vm2, %v533_v49, -inf  ;;  %v561_v52 = vpop.f32.mrf.mxu2 }
 0x1b5   :  { %565 = vmax.xlane.f32.xlu2 %v564_v50  ;;  %v567_v56 = vsel %vm307_vm2, %v561_v52, -inf }
 0x1b9   :  { %v913_v60 = vpop.eup %912 }
 0x1ba   :  { %v323_v61 = vsel %vm307_vm2, %v913_v60, 0.0 }
 0x1bb   :  { %v663_v54 = vpop.f32.mrf.mxu1 }
 0x1bc   :  { %v694_v55 = vsel %vm307_vm2, %v663_v54, -inf }
 0x1bd   :  { %695 = vmax.xlane.f32.xlu1 %v694_v55  ;;  %568 = vmax.xlane.f32.xlu2 %v567_v56 }
 0x1c3   :  { %v691_v58 = vpop.f32.mrf.mxu2 }
 0x1c4   :  { %v697_v59 = vsel %vm307_vm2, %v691_v58, -inf }
 0x1c5   :  { %698 = vmax.xlane.f32.xlu0 %v697_v59 }
 0x1cd   :  { %324 = vadd.xlane.f32.xlu0 %v323_v61 }
 0x1e1   :  { %586 = vrot.lane.b32.xlu0 %v1283_v38, %s1153_s6 }
 0x218   :  { %v434_v62 = vpop.xlane.xlu1 %433 }
 0x219   :  { %v438_v63 = vsub.f32 %v401_v40, %v434_v62 }
 0x21b   :  { %v440_v0 = vmul.f32 1.442695, %v438_v63 }
 0x21d   :  { %914 = vpow2.f32 %v440_v0 }
 0x220   :  { %v437_v1 = vpop.xlane.xlu0 %436 }
 0x221   :  { %v439_v2 = vsub.f32 %v429_v45, %v437_v1 }
 0x223   :  { %v915_v3 = vpop.eup %914  ;;  %v442_v4 = vmul.f32 1.442695, %v439_v2 }
 0x224   :  { %v444_v5 = vsel %vm307_vm2, %v915_v3, 0.0 }
 0x225   :  { %916 = vpow2.f32 %v442_v4  ;;  %445 = vadd.xlane.f32.xlu2 %v444_v5  ;;  %v158_v4 = vld [vmem:[#allocation13 + $0x38] sm:$0xff]  ;;  %v157_v5 = vld [vmem:[#allocation13 + $0x30] sm:$0xff] }
 0x226   :  { %v322_v6 = vpop.xlane.xlu1 %321  ;;  %817 = vmatpush.msra.mxu1 %v158_v4 }
 0x227   :  { %918 = vrcp.f32 %v322_v6  ;;  %v156_v6 = vld [vmem:[#allocation13 + $0x28] sm:$0xff] }
 0x228   :  { %v566_v7 = vpop.xlane.xlu2 %565  ;;  %818 = vmatpush.msra.mxu1 %v157_v5 }
 0x229   :  { %v570_v15 = vsub.f32 %v533_v49, %v566_v7  ;;  %v155_v7 = vld [vmem:[#allocation13 + $0x20] sm:$0xff] }
 0x22a   :  { %819 = vmatpush.msra.mxu1 %v156_v6 }
 0x22b   :  { %v917_v8 = vpop.eup %916  ;;  %v572_v16 = vmul.f32 1.442695, %v570_v15 }
 0x22c   :  { %v447_v9 = vsel %vm307_vm2, %v917_v8, 0.0  ;;  %820 = vmatpush.msra.mxu1 %v155_v7 }
 0x22d   :  { %v919_v10 = vpop.eup %918  ;;  %448 = vadd.xlane.f32.xlu0 %v447_v9  ;;  %v153_v9 = vld [vmem:[#allocation13 + $0x10] sm:$0xff] }
 0x22e   :  { %v328_v11 = vmul.f32 %v919_v10, %v911_v47  ;;  %v152_v10 = vld [vmem:[#allocation13 + $0x8] sm:$0xff] }
 0x230   :  { %866 = vmatmul.msk.f32.vlgmr.msra.gmra.mxu3 %vm307_vm2, %v328_v11  ;;  %v569_v12 = vpop.xlane.xlu2 %568  ;;  %v696_v18 = vpop.xlane.xlu1 %695  ;;  %v151_v11 = vld [vmem:[#allocation13] sm:$0xff] }
 0x231   :  { %v571_v13 = vsub.f32 %v561_v52, %v569_v12  ;;  %v700_v21 = vsub.f32 %v663_v54, %v696_v18 }
 0x233   :  { %v574_v14 = vmul.f32 1.442695, %v571_v13  ;;  %v702_v23 = vmul.f32 1.442695, %v700_v21 }
 0x235   :  { %920 = vpow2.f32 %v574_v14 }
 0x236   :  { %922 = vpow2.f32 %v572_v16 }
 0x238   :  { %v699_v17 = vpop.xlane.xlu0 %698 }
 0x239   :  { %v701_v31 = vsub.f32 %v691_v58, %v699_v17 }
 0x23b   :  { %v921_v20 = vpop.eup %920  ;;  %v704_v32 = vmul.f32 1.442695, %v701_v31 }
 0x23c   :  { %v579_v22 = vsel %vm307_vm2, %v921_v20, 0.0  ;;  %v923_v25 = vpop.eup %922 }
 0x23d   :  { %905 = vrot.lane.b32.xlu2 %v904_v19, %s1154_s16  ;;  %580 = vadd.xlane.f32.xlu1 %v579_v22  ;;  %v576_v26 = vsel %vm307_vm2, %v923_v25, 0.0 }
 0x240   :  { %v325_v24 = vpop.xlane.xlu0 %324 }
 0x241   :  { %612 = vrot.lane.b32.xlu0 %v1286_v39, %s1153_s6  ;;  %924 = vrcp.f32 %v325_v24  ;;  %v909_v24 = vld [vmem:[%s1342_s7] ss:$0 sm:$0xff] }
 0x242   :  { %926 = vpow2.f32 %v702_v23 }
 0x243   :  { %928 = vpow2.f32 %v704_v32 }
 0x245   :  { %577 = vadd.xlane.f32.xlu1 %v576_v26 }
 0x247   :  { %v925_v27 = vpop.eup %924 }
 0x248   :  { %v329_v28 = vmul.f32 %v925_v27, %v913_v60  ;;  %v927_v29 = vpop.eup %926 }
 0x249   :  { %742 = vrot.lane.b32.xlu0 %v1286_v39, %s1155_s17  ;;  %v706_v30 = vsel %vm307_vm2, %v927_v29, 0.0  ;;  %v929_v33 = vpop.eup %928 }
 0x24a   :  { %867 = vmatmul.msk.f32.vlgmr.msrb.gmra.mxu0 %vm307_vm2, %v329_v28  ;;  %v709_v34 = vsel %vm307_vm2, %v929_v33, 0.0 }
 0x24d   :  { %707 = vadd.xlane.f32.xlu1 %v706_v30 }
 0x253   :  { %v587_v35 = vpop.permute.xlu0 %586 }
 0x266   :  { %710 = vadd.xlane.f32.xlu2 %v709_v34  ;;  %716 = vrot.lane.b32.xlu1 %v1283_v38, %s1155_s17 }
 0x298   :  { %v446_v36 = vpop.xlane.xlu2 %445 }
 0x299   :  { %930 = vrcp.f32 %v446_v36 }
 0x29f   :  { %v931_v37 = vpop.eup %930 }
 0x2a0   :  { %v449_v39 = vpop.xlane.xlu0 %448  ;;  %v906_v40 = vpop.permute.xlu2 %905  ;;  %v452_v43 = vmul.f32 %v931_v37, %v915_v3 }
 0x2a1   :  { %932 = vrcp.f32 %v449_v39  ;;  %v908_v41 = vunpack.i.h.bf16 %v906_v40  ;;  %v907_v42 = vunpack.i.l.bf16 %v906_v40 }
 0x2a3   :  { %476 = vmatpush.msrb.mxu3 %v907_v42  ;;  %503 = vmatpush.msra.mxu0 %v908_v41 }
 0x2a4   :  { %872 = vmatmul.msk.f32.vlgmr.msrb.gmra.mxu3 %vm307_vm2, %v452_v43 }
 0x2a5   :  { %607 = vmatpush.msra.mxu3 %v587_v35 }
 0x2a7   :  { %v933_v44 = vpop.eup %932 }
 0x2a8   :  { %v453_v45 = vmul.f32 %v933_v44, %v917_v8  ;;  %v154_v8 = vld [vmem:[#allocation13 + $0x18] sm:$0xff] }
 0x2a9   :  { %821 = vmatpush.msra.mxu1 %v154_v8 }
 0x2aa   :  { %873 = vmatmul.msk.f32.vlgmr.msra.gmra.mxu0 %vm307_vm2, %v453_v45 }
 0x2ab   :  { %822 = vmatpush.msra.mxu1 %v153_v9 }
 0x2ad   :  { %823 = vmatpush.msra.mxu1 %v152_v10 }
 0x2af   :  { %824 = vmatpush.msra.mxu1 %v151_v11 }
 0x2b0   :  { %v581_v38 = vpop.xlane.xlu1 %580 }
 0x2b1   :  { %934 = vrcp.f32 %v581_v38 }
 0x2b3   :  { %v613_v46 = vpop.permute.xlu0 %612  ;;  %v350_v60 = vpop.f32.mrf.mxu3 }
 0x2b4   :  { %633 = vmatpush.msrb.mxu0 %v613_v46 }
 0x2b7   :  { %v935_v47 = vpop.eup %934 }
 0x2b8   :  { %v585_v48 = vmul.f32 %v935_v47, %v921_v20  ;;  %v578_v49 = vpop.xlane.xlu1 %577 }
 0x2b9   :  { %936 = vrcp.f32 %v578_v49 }
 0x2ba   :  { %879 = vmatmul.msk.f32.vlgmr.msrb.gmra.mxu0 %vm307_vm2, %v585_v48 }
 0x2bb   :  { %v743_v50 = vpop.permute.xlu0 %742 }
 0x2bc   :  { %763 = vmatpush.msra.mxu0 %v743_v50 }
 0x2bf   :  { %v937_v51 = vpop.eup %936 }
 0x2c0   :  { %v584_v52 = vmul.f32 %v937_v51, %v923_v25  ;;  %v708_v53 = vpop.xlane.xlu1 %707 }
 0x2c1   :  { %938 = vrcp.f32 %v708_v53 }
 0x2c2   :  { %878 = vmatmul.msk.f32.vlgmr.msra.gmra.mxu3 %vm307_vm2, %v584_v52 }
 0x2c7   :  { %v939_v54 = vpop.eup %938  ;;  %v373_v62 = vpop.f32.mrf.mxu0 }
 0x2c8   :  { %v714_v55 = vmul.f32 %v939_v54, %v927_v29 }
 0x2d8   :  { %v717_v56 = vpop.permute.xlu1 %716 }
 0x2d9   :  { %v711_v57 = vpop.xlane.xlu2 %710  ;;  %737 = vmatpush.msrb.mxu3 %v717_v56 }
 0x2da   :  { %940 = vrcp.f32 %v711_v57  ;;  %884 = vmatmul.msk.f32.vlgmr.msrb.gmra.mxu3 %vm307_vm2, %v714_v55 }
 0x2e0   :  { %v941_v58 = vpop.eup %940 }
 0x2e1   :  { %v715_v59 = vmul.f32 %v941_v58, %v929_v33 }
 0x2e3   :  { %885 = vmatmul.msk.f32.vlgmr.msra.gmra.mxu0 %vm307_vm2, %v715_v59 }
 0x327   :  { %v478_v61 = vpop.f32.mrf.mxu3  ;;  %v505_v0 = vpop.f32.mrf.mxu0 }
 0x328   :  { %770 = vrot.lane.b32.xlu1 %v478_v61, %s1156_s18 }
 0x337   :  { %v635_v1 = vpop.f32.mrf.mxu0 }
 0x345   :  { %v609_v63 = vpop.f32.mrf.mxu3 }
 0x346   :  { %778 = vrot.lane.b32.xlu0 %v609_v63, %s1157_s1 }
 0x34e   :  { %772 = vrot.lane.b32.xlu0 %v505_v0, %s1156_s18 }
 0x35d   :  { %v739_v2 = vpop.f32.mrf.mxu3 }
 0x35e   :  { %786 = vrot.lane.b32.xlu1 %v739_v2, %s1158_s3 }
 0x360   :  { %v765_v3 = vpop.f32.mrf.mxu0 }
 0x361   :  { %788 = vrot.lane.b32.xlu0 %v765_v3, %s1158_s3 }
 0x366   :  { %780 = vrot.lane.b32.xlu1 %v635_v1, %s1157_s1 }
 0x39a   :  { %v771_v13 = vpop.permute.xlu1 %770 }
 0x39b   :  { %v792_v14 = vsel %vm254_vm1, %v350_v60, %v771_v13 }
 0x3b8   :  { %v779_v12 = vpop.permute.xlu0 %778 }
 0x3b9   :  { %v794_v15 = vsel %vm162_vm0, %v792_v14, %v779_v12 }
 0x3c0   :  { %v773_v17 = vpop.permute.xlu0 %772 }
 0x3c1   :  { %v793_v19 = vsel %vm254_vm1, %v373_v62, %v773_v17 }
 0x3d0   :  { %v787_v16 = vpop.permute.xlu1 %786 }
 0x3d1   :  { %v797_v18 = vsel %vm796_vm3, %v794_v15, %v787_v16 }
 0x3d2   :  { %886 = vmatmul.msk.f32.vlgmr.msra.gmra.mxu1 %vm802_vm4, %v797_v18 }
 0x3d3   :  { %v789_v21 = vpop.permute.xlu0 %788 }
 0x3d8   :  { %v781_v20 = vpop.permute.xlu1 %780 }
 0x3d9   :  { %v795_v22 = vsel %vm162_vm0, %v793_v19, %v781_v20 }
 0x3da   :  { %v798_v23 = vsel %vm796_vm3, %v795_v22, %v789_v21 }
 0x3db   :  { %887 = vmatmul.msk.f32.gmra.mxu1 %vm802_vm4, %v798_v23 }
 0x44f   :  { %v826_v25 = vpop.f32.mrf.mxu1 }
 0x450   :  { %v827_v26 = vadd.f32 %v909_v24, %v826_v25 }
 0x452   :  { %832 = vst [vmem:[#allocation14] sm:$0xff] %v827_v26 }
 0x458   :  { %v829_v27 = vpop.f32.mrf.mxu1 }
 0x459   :  { %v830_v28 = vadd.f32 %v909_v24, %v829_v27 }
 0x45b   :  { %833 = vst [vmem:[#allocation14 + $0x8] sm:$0xff] %v830_v28 }
 0x45c   :  { %846 = dma.vmem_to_hbm [thread:$0]  %s839_s22, 256, %s841_s24, [#allocation4], %s1145_s13, %s1145_s13, %s1146_s14  }
 0x45d   :  { %1142 = dma.done.wait [#allocation4], 256  }
 0x45e   :  { %1143 = vsyncadd [#allocation4], 4294967040 }
 0x45f   :  { %851 = vsyncpa [#allocation3], 1 }
 0x460   :  { %852 = vsyncpa [#allocation6], 1 }
 0x461   :  { %853 = vsyncpa [#allocation9], 1 }
 0x462   :  { %854 = vsyncpa [#allocation12], 1 }
 0x463   :  { %855 = vsyncpa [#allocation4], 1 }

</bundles_post_ra>
